<compile_context>
chip_gen: v6e
topology: v6e:2x2x1
jax: 0.10.0
libtpu: 0.0.40
codegen_flags: <defaults>
</compile_context>

<pallas_src>
import jax
import jax.numpy as jnp
from jax import lax
from jax.experimental import pallas as pl
from jax.experimental.pallas import tpu as pltpu

BN_EPS = 1e-5


def _round_up(x, m):
    return (x + m - 1) // m * m


def projection_head_kernel(x_ref, w1_ref, gb_ref, w2_ref, o_ref):
    """One (out-tile j, hidden-tile k) grid step.

    x_ref  : (B, D_in)   resident input block (single-buffered, constant index)
    w1_ref : (D_in, tk)  contiguous W1 column slab (leading slab axis squeezed)
    gb_ref : (2, tk)     packed [gamma; beta] for this hidden slab
    w2_ref : (tk, t_out) W2 row slab
    o_ref  : (B, t_out)  f32 output block; accumulated in place across k
    """
    k = pl.program_id(1)
    inv_b = 1.0 / x_ref.shape[0]

    # ----- Layer 0: Linear(D_in -> tk hidden slab).  Bias dropped: exactly
    # cancelled by the training-mode BatchNorm mean subtraction. -------------
    h = jnp.dot(x_ref[...], w1_ref[...], preferred_element_type=jnp.float32)

    # ----- BatchNorm1d (training mode, biased variance) + ReLU, fused -------
    # One-pass stats (sum / sum-of-squares) and a single scale/shift pass:
    # no explicit `centered` intermediate (saves a full (B, tk) VPU pass and
    # a live f32 tile).  rsqrt goes to the EUP (free slot).
    s1 = jnp.sum(h, axis=0, keepdims=True)
    s2 = jnp.sum(h * h, axis=0, keepdims=True)
    mean = s1 * inv_b
    var = s2 * inv_b - mean * mean
    scale = lax.rsqrt(var + BN_EPS) * gb_ref[0:1, :]      # gamma fused, (1, tk)
    shift = gb_ref[1:2, :] - mean * scale                 # beta - mean*scale
    h = jnp.maximum(h * scale + shift, 0.0)

    # ----- Layer 1: Linear(tk slab -> t_out), accumulate directly into the
    # VMEM-resident f32 output block (no scratch, no flush copy). ------------
    contrib = jnp.dot(h.astype(w2_ref.dtype), w2_ref[...],
                      preferred_element_type=jnp.float32)

    @pl.when(k == 0)
    def _first():
        o_ref[...] = contrib

    @pl.when(k > 0)
    def _accumulate():
        o_ref[...] += contrib


def projection_head(x, w1_t, gamma, beta, w2_t, *, tk=None, out_tile=None):
    """SimCLR ProjectionHead forward (training-mode BatchNorm).

    x: (B, D_in); w1_t: (D_in, H); gamma/beta: (1, H); w2_t: (H, D_out).
    Returns the f32 projection (B, D_out).

    tk: hidden-dim tile.  Default (None) auto-selects the largest tile that
    fits ~70% of this generation's VMEM -- on v5e/v6e (128 MiB) that is
    usually tk == H (no k loop); on v7x (64 MiB) it shrinks automatically.

    out_tile: optionally splits D_out into a "parallel" grid axis.  NOTE: each
    extra out tile re-runs the layer-0 matmul and re-streams W1; for typical
    projection heads (D_out << D_in) leave it None.

    Contract notes:
      * BN statistics are per-call batch stats (training mode, per-shard under
        data parallelism); the dropped Linear bias relies on this.
      * For best MXU utilisation, make B (and out_tile, if used) a multiple of
        256 on v6e/v7x (128 suffices on v5e).
    """
    B, D_in = x.shape
    H = w1_t.shape[1]
    D_out = w2_t.shape[1]
    assert w1_t.shape[0] == D_in and w2_t.shape[0] == H
    assert gamma.shape == (1, H) and beta.shape == (1, H)

    x_isz = jnp.dtype(x.dtype).itemsize
    w_isz = jnp.dtype(w1_t.dtype).itemsize

    # --- output tiling (lane-dense, multiple of 128) --------------------------
    t_out = _round_up(out_tile, 128) if out_tile is not None else _round_up(D_out, 128)
    D_out_p = _round_up(D_out, t_out)
    n_out = D_out_p // t_out

    # --- generation-aware VMEM budget -----------------------------------------
    try:
        vmem_cap = int(pltpu.get_tpu_info().vmem_capacity_bytes)
    except Exception:
        vmem_cap = 64 * 2 ** 20  # conservative (v7x per-core) fallback

    def _vmem_needed(tk_):
        return (B * D_in * x_isz            # x: resident, single-buffered
                + 2 * D_in * tk_ * w_isz    # W1 slab, double-buffered
                + 2 * 2 * tk_ * 4           # packed gamma/beta
                + 2 * tk_ * t_out * w_isz   # W2 slab, double-buffered
                + 2 * B * t_out * 4)        # f32 output block

    H_128 = _round_up(H, 128)
    if tk is None:
        # Prefer no k loop at all (fewer grid steps, bigger contiguous DMAs);
        # shrink only if the estimate does not fit this generation's VMEM.
        tk = H_128
        budget = int(0.70 * vmem_cap)
        while tk > 128 and _vmem_needed(tk) > budget:
            tk = _round_up(tk // 2, 128)
    else:
        tk = _round_up(min(tk, H_128), 128)

    H_p = _round_up(H, tk)
    n_k = H_p // tk

    # --- pad to TPU-friendly shapes --------------------------------------------
    if H_p != H:
        # Padded hidden features: h = 0 -> BN gives beta_pad = 0 -> ReLU 0, and
        # the matching zero rows of W2 contribute nothing to the output.
        w1_t = jnp.pad(w1_t, ((0, 0), (0, H_p - H)))
        gamma = jnp.pad(gamma, ((0, 0), (0, H_p - H)), constant_values=1.0)
        beta = jnp.pad(beta, ((0, 0), (0, H_p - H)))
        w2_t = jnp.pad(w2_t, ((0, H_p - H), (0, 0)))
    if D_out_p != D_out:
        w2_t = jnp.pad(w2_t, ((0, 0), (0, D_out_p - D_out)))

    # gamma/beta packed into one (2, H_p) f32 array: a single small DMA per slab.
    gb = jnp.concatenate([gamma, beta], axis=0).astype(jnp.float32)

    # Contiguous per-k W1 slabs (n_k, D_in, tk): each slab is one unstrided HBM
    # stream (the kernel is weight-streaming bound at small batch).
    w1_slabs = w1_t.reshape(D_in, n_k, tk).transpose(1, 0, 2)

    in_specs = [
        # x block: constant index across the whole grid -> single buffer.
        pl.BlockSpec((B, D_in), lambda j, k: (0, 0), pipeline_mode=pl.Buffered(1)),
        # W1 slab: squeezed leading slab axis, contiguous stream per k.
        pl.BlockSpec((None, D_in, tk), lambda j, k: (k, 0, 0)),
        # packed gamma/beta slab.
        pl.BlockSpec((2, tk), lambda j, k: (0, k)),
        # W2 row slab.
        pl.BlockSpec((tk, t_out), lambda j, k: (k, j)),
    ]
    out_spec = pl.BlockSpec((B, t_out), lambda j, k: (0, j))

    # --- VMEM limit: tight estimate + headroom, capped at 75% of capacity ------
    vmem_needed = _vmem_needed(tk)
    vmem_limit = int(min(max(vmem_needed + (4 << 20), 16 << 20),
                         int(0.75 * vmem_cap)))

    # Cost estimate includes the layer-0 recompute factor when out-tiling.
    cost = pl.CostEstimate(
        flops=2 * B * H_p * (n_out * D_in + D_out_p),
        transcendentals=n_out * H_p,  # one rsqrt per hidden feature per out tile
        bytes_accessed=(
            x.size * x_isz
            + n_out * w1_slabs.size * w_isz
            + w2_t.size * w_isz
            + n_out * gb.size * 4
            + B * D_out_p * 4
        ),
    )

    out_p = pl.pallas_call(
        projection_head_kernel,
        out_shape=jax.ShapeDtypeStruct((B, D_out_p), jnp.float32),
        grid_spec=pltpu.PrefetchScalarGridSpec(
            num_scalar_prefetch=0,
            grid=(n_out, n_k),
            in_specs=in_specs,
            out_specs=out_spec,
        ),
        compiler_params=pltpu.CompilerParams(
            dimension_semantics=("parallel", "arbitrary"),
            vmem_limit_bytes=vmem_limit,
        ),
        cost_estimate=cost,
    )(x, w1_slabs, gb, w2_t)

    return out_p[:, :D_out]


def projection_head_reference(x, w1_t, b1, gamma, beta, w2_t):
    """Pure-JAX reference matching the kernel's mixed precision (bf16 matmul
    operands, f32 accumulation / BN math).  Keeps the Linear bias b1 (as the
    PyTorch module does) to confirm training-mode BN cancels it."""
    h = jnp.dot(x, w1_t, preferred_element_type=jnp.float32) + b1
    mean = jnp.mean(h, axis=0, keepdims=True)
    var = jnp.mean((h - mean) ** 2, axis=0, keepdims=True)
    h = (h - mean) * lax.rsqrt(var + BN_EPS) * gamma + beta
    h = jnp.maximum(h, 0.0)
    return jnp.dot(h.astype(w2_t.dtype), w2_t, preferred_element_type=jnp.float32)


if __name__ == "__main__":
    # Small, MXU-friendly demo shapes: a real batch (128 rows) so the systolic
    # array is fed; D_in = 256 with an explicit tk=128 run exercises the
    # k-tiled / in-place output accumulation path; D_out = 64 exercises the
    # lane-dense output padding + wrapper slice.
    B, D_in, D_out = 128, 256, 64

    key = jax.random.PRNGKey(0)
    k_x, k_w1, k_b1, k_w2, k_g, k_b = jax.random.split(key, 6)

    x_f32 = jax.random.normal(k_x, (B, D_in), dtype=jnp.float32)

    # PyTorch Linear stores weight as (out, in); build that, transpose once.
    bound1 = 1.0 / (D_in ** 0.5)
    w1 = jax.random.uniform(k_w1, (D_in, D_in), jnp.float32, -bound1, bound1)
    b1 = jax.random.uniform(k_b1, (1, D_in), jnp.float32, -bound1, bound1)
    w2 = jax.random.uniform(k_w2, (D_out, D_in), jnp.float32, -bound1, bound1)
    # Non-trivial BN affine params (exercise the gamma/beta fusion; a fresh
    # module would have gamma=1, beta=0).
    gamma = 1.0 + 0.1 * jax.random.normal(k_g, (1, D_in), jnp.float32)
    beta = 0.1 * jax.random.normal(k_b, (1, D_in), jnp.float32)

    # bf16 MXU operands; accumulation / BN math stays f32 inside the kernel.
    x = x_f32.astype(jnp.bfloat16)
    w1_t = w1.T.astype(jnp.bfloat16)   # (D_in, D_in)
    w2_t = w2.T.astype(jnp.bfloat16)   # (D_in, D_out)

    ref = projection_head_reference(x, w1_t, b1, gamma, beta, w2_t)

    # 1) auto tk (-> tk = H, single k step: the recommended v5e/v6e config)
    out_auto = jax.block_until_ready(projection_head(x, w1_t, gamma, beta, w2_t))
    # 2) explicit tk=128 (two k steps: exercises in-place o_ref accumulation)
    out_tiled = jax.block_until_ready(
        projection_head(x, w1_t, gamma, beta, w2_t, tk=128))

    for out in (out_auto, out_tiled):
        assert out.shape == (B, D_out)
        assert out.dtype == jnp.float32
        assert jnp.allclose(out, ref, atol=5e-3, rtol=5e-3), "mismatch vs reference"

    # TODO(synk): BatchNorm1d running_mean/running_var buffer updates (a
    # training-mode side effect, not part of the forward output) are not
    # emitted by this kernel.

    print("KERNEL_OK")
</pallas_src>

<mosaic_0001>
module attributes {stable_mosaic.version = 11 : i64} {
  func.func @projection_head_kernel(%arg0: i32, %arg1: i32, %arg2: memref<128x256xbf16, #tpu.memory_space<vmem>>, %arg3: memref<1x256x256xbf16, #tpu.memory_space<vmem>>, %arg4: memref<2x256xf32, #tpu.memory_space<vmem>>, %arg5: memref<256x128xbf16, #tpu.memory_space<vmem>>, %arg6: memref<128x128xf32, #tpu.memory_space<vmem>>) attributes {dimension_semantics = [#tpu.dimension_semantics<parallel>, #tpu.dimension_semantics<arbitrary>], iteration_bounds = array<i64: 1, 1>, scalar_prefetch = 0 : i64, scratch_operands = 0 : i64, tpu.core_type = #tpu.core_type<tc>, window_params = [{pipeline_mode = #tpu.pipeline_mode<synchronous>, transform_indices = @transform_0, window_bounds = array<i64: 128, 256>}, {transform_indices = @transform_1, window_bounds = array<i64: 1, 256, 256>}, {transform_indices = @transform_2, window_bounds = array<i64: 2, 256>}, {transform_indices = @transform_3, window_bounds = array<i64: 256, 128>}, {transform_indices = @transform_4, window_bounds = array<i64: 128, 128>}]} {
    %c0 = arith.constant 0 : index
    %c0_0 = arith.constant 0 : index
    %0 = vector.load %arg2[%c0, %c0_0] : memref<128x256xbf16, #tpu.memory_space<vmem>>, vector<128x256xbf16>
    %c0_1 = arith.constant 0 : index
    %c0_2 = arith.constant 0 : index
    %c0_3 = arith.constant 0 : index
    %1 = vector.load %arg3[%c0_1, %c0_2, %c0_3] : memref<1x256x256xbf16, #tpu.memory_space<vmem>>, vector<1x256x256xbf16>
    %2 = vector.shape_cast %1 : vector<1x256x256xbf16> to vector<256x256xbf16>
    %cst = arith.constant dense<0.000000e+00> : vector<128x256xf32>
    %3 = tpu.matmul %0, %2, %cst {dimension_numbers = #tpu.dot_dimension_numbers<[1], [0], [0], [1], [0, 0, 1, 1], [], []>} : vector<128x256xbf16>, vector<256x256xbf16>, vector<128x256xf32> -> vector<128x256xf32>
    %cst_4 = arith.constant dense<0.000000e+00> : vector<256xf32>
    %4 = vector.multi_reduction <add>, %3, %cst_4 [0] : vector<128x256xf32> to vector<256xf32>
    %5 = vector.shape_cast %4 : vector<256xf32> to vector<1x256xf32>
    %6 = arith.mulf %3, %3 : vector<128x256xf32>
    %cst_5 = arith.constant dense<0.000000e+00> : vector<256xf32>
    %7 = vector.multi_reduction <add>, %6, %cst_5 [0] : vector<128x256xf32> to vector<256xf32>
    %8 = vector.shape_cast %7 : vector<256xf32> to vector<1x256xf32>
    %cst_6 = arith.constant 7.812500e-03 : f32
    %9 = vector.broadcast %cst_6 : f32 to vector<1x256xf32>
    %10 = arith.mulf %5, %9 : vector<1x256xf32>
    %cst_7 = arith.constant 7.812500e-03 : f32
    %11 = vector.broadcast %cst_7 : f32 to vector<1x256xf32>
    %12 = arith.mulf %8, %11 : vector<1x256xf32>
    %13 = arith.mulf %10, %10 : vector<1x256xf32>
    %14 = arith.subf %12, %13 : vector<1x256xf32>
    %cst_8 = arith.constant 9.99999974E-6 : f32
    %15 = vector.broadcast %cst_8 : f32 to vector<1x256xf32>
    %16 = arith.addf %14, %15 : vector<1x256xf32>
    %17 = math.rsqrt %16 : vector<1x256xf32>
    %c0_9 = arith.constant 0 : index
    %c0_10 = arith.constant 0 : index
    %18 = vector.load %arg4[%c0_9, %c0_10] : memref<2x256xf32, #tpu.memory_space<vmem>>, vector<1x256xf32>
    %19 = arith.mulf %17, %18 : vector<1x256xf32>
    %c1 = arith.constant 1 : index
    %c0_11 = arith.constant 0 : index
    %20 = vector.load %arg4[%c1, %c0_11] : memref<2x256xf32, #tpu.memory_space<vmem>>, vector<1x256xf32>
    %21 = arith.mulf %10, %19 : vector<1x256xf32>
    %22 = arith.subf %20, %21 : vector<1x256xf32>
    %23 = vector.broadcast %19 : vector<1x256xf32> to vector<128x256xf32>
    %24 = arith.mulf %3, %23 : vector<128x256xf32>
    %25 = vector.broadcast %22 : vector<1x256xf32> to vector<128x256xf32>
    %26 = arith.addf %24, %25 : vector<128x256xf32>
    %cst_12 = arith.constant 0.000000e+00 : f32
    %27 = vector.broadcast %cst_12 : f32 to vector<128x256xf32>
    %28 = arith.maximumf %26, %27 : vector<128x256xf32>
    %29 = arith.truncf %28 : vector<128x256xf32> to vector<128x256xbf16>
    %c0_13 = arith.constant 0 : index
    %c0_14 = arith.constant 0 : index
    %30 = vector.load %arg5[%c0_13, %c0_14] : memref<256x128xbf16, #tpu.memory_space<vmem>>, vector<256x128xbf16>
    %cst_15 = arith.constant dense<0.000000e+00> : vector<128x128xf32>
    %31 = tpu.matmul %29, %30, %cst_15 {dimension_numbers = #tpu.dot_dimension_numbers<[1], [0], [0], [1], [0, 0, 1, 1], [], []>} : vector<128x256xbf16>, vector<256x128xbf16>, vector<128x128xf32> -> vector<128x128xf32>
    %c0_i32 = arith.constant 0 : i32
    %32 = arith.cmpi eq, %arg1, %c0_i32 : i32
    %33 = arith.extui %32 : i1 to i32
    %c0_i32_16 = arith.constant 0 : i32
    %34 = arith.cmpi ne, %33, %c0_i32_16 : i32
    scf.if %34 {
      %c0_19 = arith.constant 0 : index
      %c0_20 = arith.constant 0 : index
      %38 = vector.load %arg6[%c0_19, %c0_20] : memref<128x128xf32, #tpu.memory_space<vmem>>, vector<128x128xf32>
      tpu.vector_store %arg6[%c0_19, %c0_20], %31 {strides = array<i32>} : memref<128x128xf32, #tpu.memory_space<vmem>>, vector<128x128xf32>,
    } else {
    }
    %c0_i32_17 = arith.constant 0 : i32
    %35 = arith.cmpi sgt, %arg1, %c0_i32_17 : i32
    %36 = arith.extui %35 : i1 to i32
    %c0_i32_18 = arith.constant 0 : i32
    %37 = arith.cmpi ne, %36, %c0_i32_18 : i32
    scf.if %37 {
      %c0_19 = arith.constant 0 : index
      %c0_20 = arith.constant 0 : index
      %38 = vector.load %arg6[%c0_19, %c0_20] : memref<128x128xf32, #tpu.memory_space<vmem>>, vector<128x128xf32>
      %39 = arith.addf %38, %31 : vector<128x128xf32>
      %c0_21 = arith.constant 0 : index
      %c0_22 = arith.constant 0 : index
      %40 = vector.load %arg6[%c0_21, %c0_22] : memref<128x128xf32, #tpu.memory_space<vmem>>, vector<128x128xf32>
      tpu.vector_store %arg6[%c0_21, %c0_22], %39 {strides = array<i32>} : memref<128x128xf32, #tpu.memory_space<vmem>>, vector<128x128xf32>,
    } else {
    }
    return
  }
  func.func @transform_0(%arg0: i32, %arg1: i32) -> (i32, i32) {
    %c0_i32 = arith.constant 0 : i32
    %c0_i32_0 = arith.constant 0 : i32
    %c0_i32_1 = arith.constant 0 : i32
    return %c0_i32, %c0_i32_0 : i32, i32
  }
  func.func @transform_1(%arg0: i32, %arg1: i32) -> (i32, i32, i32) {
    %c0_i32 = arith.constant 0 : i32
    %c0_i32_0 = arith.constant 0 : i32
    %c0_i32_1 = arith.constant 0 : i32
    return %arg1, %c0_i32, %c0_i32_0 : i32, i32, i32
  }
  func.func @transform_2(%arg0: i32, %arg1: i32) -> (i32, i32) {
    %c0_i32 = arith.constant 0 : i32
    %c0_i32_0 = arith.constant 0 : i32
    return %c0_i32, %arg1 : i32, i32
  }
  func.func @transform_3(%arg0: i32, %arg1: i32) -> (i32, i32) {
    %c0_i32 = arith.constant 0 : i32
    return %arg1, %arg0 : i32, i32
  }
  func.func @transform_4(%arg0: i32, %arg1: i32) -> (i32, i32) {
    %c0_i32 = arith.constant 0 : i32
    %c0_i32_0 = arith.constant 0 : i32
    return %c0_i32, %arg0 : i32, i32
  }
}

</mosaic_0001>

<bundles_post_ra>
// kernel: tpu_custom_call.1
= control target key start
LH: loop header
LB: loop body
LE: loop exit
PB: predicated region body
PF: predicated region fallthrough
CT: control target
= control target key end

     0   :  { %9 = vsyncpa [#allocation3], 0  ;;  %s1746_s0 = inlined_call_operand.hbm [shape: bf16[128,256], index: 0, kind: input, shape index: {}]   ;;  %s1747_s1 = inlined_call_operand.hbm [shape: bf16[1,256,256], index: 1, kind: input, shape index: {}]   ;;  %s1748_s2 = inlined_call_operand.hbm [shape: f32[2,256], index: 2, kind: input, shape index: {}]   ;;  %s1749_s3 = inlined_call_operand.hbm [shape: bf16[256,128], index: 3, kind: input, shape index: {}]   ;;  %s1750_s4 = inlined_call_operand.hbm [shape: f32[128,128], index: 4, kind: output, shape index: {}]  }
   0x1   :  { %10 = vsyncpa [#allocation6], 0 }
   0x2   :  { %11 = vsyncpa [#allocation9], 0 }
   0x3   :  { %12 = vsyncpa [#allocation4], 0  ;;  %s1423_s15 = smov [#allocation5]   ;;  %s1424_s17 = smov [#allocation2]  }
   0x4   :  { %s30_s16 = sshll.u32 %s1423_s15, 4  ;;  %s18_s18 = sshll.u32 %s1424_s17, 4  ;;  %s31_s16 = int_to_ptr.vmem [resolvable:$true] %s30_s16  ;;  %s19_s18 = int_to_ptr.vmem [resolvable:$true] %s18_s18 }
   0x5   :  { %s1323_s19 = scalar_lea.vmem %s31_s16, 4096  ;;  %p1328_p1 = scmp.lt.s32.totalorder %s31_s16, %s31_s16 }
   0x6   :  { %p1324_p0 = scmp.ne.s32.totalorder %s31_s16, %s1323_s19  ;;  %p1329_p2 = scmp.lt.s32.totalorder %s1323_s19, %s1323_s19 }
   0x8   :  { %p1330_p3 = por %p1329_p2, %p1328_p1 }
   0xa   :  { %p1331_p4 = pnand %p1330_p3, %p1324_p0 }
   0xc   :  { %1334 = shalt.err (!%p1331_p4)
}
   0xd   :  { %s1425_s20 = smov 128   ;;  %s1426_s21 = smov 8  }
   0xe   :  { %36 = dma.hbm_to_vmem [thread:$0]  %s1747_s1, 4096, %s31_s16, [#allocation6], %s1425_s20, %s1425_s20, %s1426_s21  }
   0xf   :  { %s1343_s24 = scalar_lea.vmem %s19_s18, 2048  ;;  %p1348_p6 = scmp.lt.s32.totalorder %s19_s18, %s19_s18 }
  0x10   :  { %p1344_p5 = scmp.ne.s32.totalorder %s19_s18, %s1343_s24  ;;  %p1349_p7 = scmp.lt.s32.totalorder %s1343_s24, %s1343_s24 }
  0x12   :  { %p1350_p8 = por %p1349_p7, %p1348_p6 }
  0x14   :  { %p1351_p9 = pnand %p1350_p8, %p1344_p5 }
  0x16   :  { %1354 = shalt.err (!%p1351_p9)
}
  0x17   :  { %24 = dma.hbm_to_vmem [thread:$0]  %s1746_s0, 2048, %s19_s18, [#allocation3], %s1425_s20, %s1425_s20, %s1426_s21  }
  0x18   :  { %s1427_s27 = smov [#allocation7]   ;;  %s1428_s29 = smov [#allocation8]  }
  0x19   :  { %s43_s28 = sshll.u32 %s1427_s27, 4  ;;  %s52_s30 = sshll.u32 %s1428_s29, 4  ;;  %s44_s28 = int_to_ptr.vmem [resolvable:$true] %s43_s28  ;;  %s53_s30 = int_to_ptr.vmem [resolvable:$true] %s52_s30 }
  0x1a   :  { %s1363_s1 = scalar_lea.vmem %s44_s28, 64  ;;  %p1368_p11 = scmp.lt.s32.totalorder %s44_s28, %s44_s28 }
  0x1b   :  { %p1364_p10 = scmp.ne.s32.totalorder %s44_s28, %s1363_s1  ;;  %p1369_p12 = scmp.lt.s32.totalorder %s1363_s1, %s1363_s1 }
  0x1d   :  { %p1370_p13 = por %p1369_p12, %p1368_p11 }
  0x1f   :  { %p1371_p0 = pnand %p1370_p13, %p1364_p10 }
  0x21   :  { %1374 = shalt.err (!%p1371_p0)
}
  0x22   :  { %46 = dma.hbm_to_vmem [thread:$0]  %s1748_s2, 64, %s44_s28, [#allocation6]  }
  0x23   :  { %s1383_s7 = scalar_lea.vmem %s53_s30, 2048  ;;  %p1388_p2 = scmp.lt.s32.totalorder %s53_s30, %s53_s30 }
  0x24   :  { %p1384_p1 = scmp.ne.s32.totalorder %s53_s30, %s1383_s7  ;;  %p1389_p3 = scmp.lt.s32.totalorder %s1383_s7, %s1383_s7 }
  0x26   :  { %p1390_p4 = por %p1389_p3, %p1388_p2 }
  0x28   :  { %p1391_p5 = pnand %p1390_p4, %p1384_p1 }
  0x2a   :  { %1394 = shalt.err (!%p1391_p5)
}
  0x2b   :  { %s1429_s0 = smov 64   ;;  %s1430_s8 = smov 4  }
  0x2c   :  { %58 = dma.hbm_to_vmem [thread:$0]  %s1749_s3, 2048, %s53_s30, [#allocation9], %s1429_s0, %s1429_s0, %s1430_s8  }
  0x2d   :  { %1415 = dma.done.wait [#allocation3], 2048  }
  0x2e   :  { %1416 = vsyncadd [#allocation3], 4294965248 }
  0x2f   :  { %1417 = dma.done.wait [#allocation6], 4160  }
  0x30   :  { %1418 = vsyncadd [#allocation6], 4294963136 }
  0x31   :  { %1419 = dma.done.wait [#allocation9], 2048  }
  0x32   :  { %1420 = vsyncadd [#allocation9], 4294965248  ;;  %v1223_v0 = vld [vmem:[#allocation5 + $0x74] ss:$8 sps:$4 sm:$0xff]   ;;  %v1225_v1 = vld [vmem:[#allocation5 + $0x70] ss:$8 sps:$4 sm:$0xff]  }
  0x33   :  { %360 = vmatprep.subr.bf16.mxu0 %v1223_v0  ;;  %v1226_v2 = vld [vmem:[#allocation5 + $0x64] ss:$8 sps:$4 sm:$0xff]   ;;  %v1228_v3 = vld [vmem:[#allocation5 + $0x60] ss:$8 sps:$4 sm:$0xff]   ;;  %v1229_v4 = vld [vmem:[#allocation5 + $0x54] ss:$8 sps:$4 sm:$0xff]  }
  0x34   :  { %361 = vmatpush1.bf16.msra.mxu0 %v1225_v1  ;;  %v1231_v5 = vld [vmem:[#allocation5 + $0x50] ss:$8 sps:$4 sm:$0xff]   ;;  %v1232_v6 = vld [vmem:[#allocation5 + $0x44] ss:$8 sps:$4 sm:$0xff]   ;;  %v1234_v7 = vld [vmem:[#allocation5 + $0x40] ss:$8 sps:$4 sm:$0xff]  }
  0x35   :  { %362 = vmatprep.subr.bf16.mxu0 %v1226_v2  ;;  %v1235_v8 = vld [vmem:[#allocation5 + $0x34] ss:$8 sps:$4 sm:$0xff]   ;;  %v1237_v9 = vld [vmem:[#allocation5 + $0x30] ss:$8 sps:$4 sm:$0xff]   ;;  %v1238_v10 = vld [vmem:[#allocation5 + $0x24] ss:$8 sps:$4 sm:$0xff]  }
  0x36   :  { %v1240_v11 = vld [vmem:[#allocation5 + $0x20] ss:$8 sps:$4 sm:$0xff]   ;;  %v1241_v12 = vld [vmem:[#allocation5 + $0x14] ss:$8 sps:$4 sm:$0xff]   ;;  %v1273_v13 = vld [vmem:[#allocation2 + $0x4] ss:$8 sps:$4 sm:$0xff]  }
  0x37   :  { %v1243_v14 = vld [vmem:[#allocation5 + $0x10] ss:$8 sps:$4 sm:$0xff]   ;;  %v1244_v15 = vld [vmem:[#allocation5 + $0x4] ss:$8 sps:$4 sm:$0xff]   ;;  %392 = vmatprep.mubr.bf16.mxu0 %v1273_v13  ;;  %v1246_v16 = vld [vmem:[#allocation5] ss:$8 sps:$4 sm:$0xff]  }
  0x38   :  { %363 = vmatpush1.bf16.msra.mxu0 %v1228_v3  ;;  %v1247_v17 = vld [vmem:[#allocation5 + $0xf4] ss:$8 sps:$4 sm:$0xff]   ;;  %v1249_v18 = vld [vmem:[#allocation5 + $0xf0] ss:$8 sps:$4 sm:$0xff]   ;;  %v1250_v19 = vld [vmem:[#allocation5 + $0xe4] ss:$8 sps:$4 sm:$0xff]  }
  0x39   :  { %364 = vmatprep.subr.bf16.mxu0 %v1229_v4  ;;  %v1252_v20 = vld [vmem:[#allocation5 + $0xe0] ss:$8 sps:$4 sm:$0xff]   ;;  %v1253_v21 = vld [vmem:[#allocation5 + $0xd4] ss:$8 sps:$4 sm:$0xff]   ;;  %v1255_v22 = vld [vmem:[#allocation5 + $0xd0] ss:$8 sps:$4 sm:$0xff]  }
  0x3a   :  { %v1256_v23 = vld [vmem:[#allocation5 + $0xc4] ss:$8 sps:$4 sm:$0xff]   ;;  %v1258_v24 = vld [vmem:[#allocation5 + $0xc0] ss:$8 sps:$4 sm:$0xff]   ;;  %v1259_v25 = vld [vmem:[#allocation5 + $0xb4] ss:$8 sps:$4 sm:$0xff]  }
  0x3b   :  { %v1261_v26 = vld [vmem:[#allocation5 + $0xb0] ss:$8 sps:$4 sm:$0xff]   ;;  %v1262_v27 = vld [vmem:[#allocation5 + $0xa4] ss:$8 sps:$4 sm:$0xff]   ;;  %v1264_v28 = vld [vmem:[#allocation5 + $0xa0] ss:$8 sps:$4 sm:$0xff]  }
  0x3c   :  { %365 = vmatpush1.bf16.msra.mxu0 %v1231_v5  ;;  %v1265_v29 = vld [vmem:[#allocation5 + $0x94] ss:$8 sps:$4 sm:$0xff]   ;;  %v1267_v30 = vld [vmem:[#allocation5 + $0x90] ss:$8 sps:$4 sm:$0xff]   ;;  %v1268_v31 = vld [vmem:[#allocation5 + $0x84] ss:$8 sps:$4 sm:$0xff]  }
  0x3d   :  { %366 = vmatprep.subr.bf16.mxu0 %v1232_v6  ;;  %v1270_v32 = vld [vmem:[#allocation5 + $0x80] ss:$8 sps:$4 sm:$0xff]   ;;  %v1274_v34 = vld [vmem:[#allocation2 + $0x14] ss:$8 sps:$4 sm:$0xff]   ;;  %v1276_v35 = vld [vmem:[#allocation2 + $0x10] ss:$8 sps:$4 sm:$0xff]  }
  0x3e   :  { %v1271_v33 = vld [vmem:[#allocation2] ss:$8 sps:$4 sm:$0xff]   ;;  %v1277_v36 = vld [vmem:[#allocation2 + $0x24] ss:$8 sps:$4 sm:$0xff]   ;;  %v1280_v38 = vld [vmem:[#allocation2 + $0x34] ss:$8 sps:$4 sm:$0xff]  }
  0x3f   :  { %v1279_v37 = vld [vmem:[#allocation2 + $0x20] ss:$8 sps:$4 sm:$0xff]   ;;  %v1282_v39 = vld [vmem:[#allocation2 + $0x30] ss:$8 sps:$4 sm:$0xff]   ;;  %v1283_v40 = vld [vmem:[#allocation2 + $0x44] ss:$8 sps:$4 sm:$0xff]  }
  0x40   :  { %367 = vmatpush1.bf16.msra.mxu0 %v1234_v7  ;;  %v1285_v41 = vld [vmem:[#allocation2 + $0x40] ss:$8 sps:$4 sm:$0xff]   ;;  %v1286_v42 = vld [vmem:[#allocation2 + $0x54] ss:$8 sps:$4 sm:$0xff]   ;;  %v1288_v43 = vld [vmem:[#allocation2 + $0x50] ss:$8 sps:$4 sm:$0xff]  }
  0x41   :  { %368 = vmatprep.subr.bf16.mxu0 %v1235_v8  ;;  %v1289_v44 = vld [vmem:[#allocation2 + $0x64] ss:$8 sps:$4 sm:$0xff]   ;;  %v1291_v45 = vld [vmem:[#allocation2 + $0x60] ss:$8 sps:$4 sm:$0xff]   ;;  %v1292_v46 = vld [vmem:[#allocation2 + $0x74] ss:$8 sps:$4 sm:$0xff]  }
  0x42   :  { %v1294_v47 = vld [vmem:[#allocation2 + $0x70] ss:$8 sps:$4 sm:$0xff]   ;;  %v1295_v48 = vld [vmem:[#allocation8 + $0x78] sm:$0xff]   ;;  %v1301_v54 = vld [vmem:[#allocation8 + $0x60] sm:$0xff]   ;;  %s1432_s2 = smov [#allocation10]  }
  0x43   :  { %v1296_v49 = vld [vmem:[#allocation8 + $0x38] sm:$0xff]   ;;  %1149 = vmatprep.subr.bf16.mxu1 %v1295_v48  ;;  %v1297_v50 = vld [vmem:[#allocation8 + $0x70] sm:$0xff]   ;;  %v1299_v52 = vld [vmem:[#allocation8 + $0x68] sm:$0xff]   ;;  %s1071_s3 = sshll.u32 %s1432_s2, 4  ;;  %s1072_s3 = int_to_ptr.vmem [resolvable:$true] %s1071_s3 }
  0x44   :  { %369 = vmatpush1.bf16.msra.mxu0 %v1237_v9  ;;  %1150 = vmatpush3.bf16.msra.mxu1 %v1296_v49  ;;  %v1298_v51 = vld [vmem:[#allocation8 + $0x30] sm:$0xff]   ;;  %v1300_v53 = vld [vmem:[#allocation8 + $0x28] sm:$0xff]   ;;  %v1302_v55 = vld [vmem:[#allocation8 + $0x20] sm:$0xff]   ;;  %s1395_s11 = scalar_lea.vmem %s1072_s3, 2048  ;;  %p1400_p7 = scmp.lt.s32.totalorder %s1072_s3, %s1072_s3 }
  0x45   :  { %370 = vmatprep.subr.bf16.mxu0 %v1238_v10  ;;  %1151 = vmatprep.subr.bf16.mxu1 %v1297_v50  ;;  %v1303_v56 = vld [vmem:[#allocation8 + $0x58] sm:$0xff]   ;;  %v1305_v58 = vld [vmem:[#allocation8 + $0x50] sm:$0xff]   ;;  %v1307_v60 = vld [vmem:[#allocation8 + $0x48] sm:$0xff]   ;;  %p1396_p6 = scmp.ne.s32.totalorder %s1072_s3, %s1395_s11  ;;  %p1401_p8 = scmp.lt.s32.totalorder %s1395_s11, %s1395_s11 }
  0x46   :  { %v1304_v57 = vld [vmem:[#allocation8 + $0x18] sm:$0xff]   ;;  %v1306_v59 = vld [vmem:[#allocation8 + $0x10] sm:$0xff]   ;;  %v1308_v61 = vld [vmem:[#allocation8 + $0x8] sm:$0xff]  }
  0x47   :  { %v1309_v62 = vld [vmem:[#allocation8 + $0x40] sm:$0xff]   ;;  %p1402_p9 = por %p1401_p8, %p1400_p7 }
  0x48   :  { %371 = vmatpush1.bf16.msra.mxu0 %v1240_v11  ;;  %1152 = vmatpush3.bf16.msra.mxu1 %v1298_v51  ;;  %v1310_v63 = vld [vmem:[#allocation8] sm:$0xff]  }
  0x49   :  { %372 = vmatprep.subr.bf16.mxu0 %v1241_v12  ;;  %1153 = vmatprep.subr.bf16.mxu1 %v1299_v52  ;;  %p1403_p10 = pnand %p1402_p9, %p1396_p6 }
  0x4c   :  { %373 = vmatpush1.bf16.msra.mxu0 %v1243_v14  ;;  %1154 = vmatpush3.bf16.msra.mxu1 %v1300_v53 }
  0x4d   :  { %374 = vmatprep.subr.bf16.mxu0 %v1244_v15  ;;  %1155 = vmatprep.subr.bf16.mxu1 %v1301_v54 }
  0x50   :  { %375 = vmatpush1.bf16.msra.mxu0 %v1246_v16  ;;  %1156 = vmatpush3.bf16.msra.mxu1 %v1302_v55 }
  0x51   :  { %376 = vmatprep.subr.bf16.mxu0 %v1247_v17  ;;  %1157 = vmatprep.subr.bf16.mxu1 %v1303_v56 }
  0x54   :  { %377 = vmatpush2.bf16.msra.mxu0 %v1249_v18  ;;  %1158 = vmatpush3.bf16.msra.mxu1 %v1304_v57 }
  0x55   :  { %378 = vmatprep.subr.bf16.mxu0 %v1250_v19  ;;  %1159 = vmatprep.subr.bf16.mxu1 %v1305_v58 }
  0x58   :  { %379 = vmatpush2.bf16.msra.mxu0 %v1252_v20  ;;  %1160 = vmatpush3.bf16.msra.mxu1 %v1306_v59 }
  0x59   :  { %380 = vmatprep.subr.bf16.mxu0 %v1253_v21  ;;  %1161 = vmatprep.subr.bf16.mxu1 %v1307_v60 }
  0x5c   :  { %381 = vmatpush2.bf16.msra.mxu0 %v1255_v22  ;;  %1162 = vmatpush3.bf16.msra.mxu1 %v1308_v61 }
  0x5d   :  { %382 = vmatprep.subr.bf16.mxu0 %v1256_v23  ;;  %1163 = vmatprep.subr.bf16.mxu1 %v1309_v62 }
  0x60   :  { %383 = vmatpush2.bf16.msra.mxu0 %v1258_v24  ;;  %1164 = vmatpush3.bf16.msra.mxu1 %v1310_v63 }
  0x61   :  { %384 = vmatprep.subr.bf16.mxu0 %v1259_v25 }
  0x64   :  { %385 = vmatpush2.bf16.msra.mxu0 %v1261_v26 }
  0x65   :  { %386 = vmatprep.subr.bf16.mxu0 %v1262_v27 }
  0x68   :  { %387 = vmatpush2.bf16.msra.mxu0 %v1264_v28 }
  0x69   :  { %388 = vmatprep.subr.bf16.mxu0 %v1265_v29 }
  0x6c   :  { %389 = vmatpush2.bf16.msra.mxu0 %v1267_v30 }
  0x6d   :  { %390 = vmatprep.subr.bf16.mxu0 %v1268_v31 }
  0x70   :  { %391 = vmatpush2.bf16.msra.mxu0 %v1270_v32 }
  0x73   :  { %393 = vmatmul.mubr.bf16.vlgmr.msra.gmra.mxu0 %v1271_v33 }
  0x74   :  { %402 = vmatprep.mubr.bf16.mxu0 %v1274_v34 }
  0x7b   :  { %403 = vmatmul.mubr.bf16.gmra.mxu0 %v1276_v35 }
  0x7c   :  { %412 = vmatprep.mubr.bf16.mxu0 %v1277_v36 }
  0x83   :  { %413 = vmatmul.mubr.bf16.gmra.mxu0 %v1279_v37 }
  0x84   :  { %422 = vmatprep.mubr.bf16.mxu0 %v1280_v38 }
  0x8b   :  { %423 = vmatmul.mubr.bf16.gmra.mxu0 %v1282_v39 }
  0x8c   :  { %432 = vmatprep.mubr.bf16.mxu0 %v1283_v40 }
  0x93   :  { %433 = vmatmul.mubr.bf16.gmra.mxu0 %v1285_v41 }
  0x94   :  { %442 = vmatprep.mubr.bf16.mxu0 %v1286_v42 }
  0x9b   :  { %443 = vmatmul.mubr.bf16.gmra.mxu0 %v1288_v43 }
  0x9c   :  { %452 = vmatprep.mubr.bf16.mxu0 %v1289_v44 }
  0xa3   :  { %453 = vmatmul.mubr.bf16.gmra.mxu0 %v1291_v45 }
  0xa4   :  { %462 = vmatprep.mubr.bf16.mxu0 %v1292_v46 }
  0xab   :  { %463 = vmatmul.mubr.bf16.gmra.mxu0 %v1294_v47 }
 0x133   :  { %v1476_v0 = vpop.f32.mrf.mxu0 }
 0x134   :  { %v515_v19 = vmul.f32 %v1476_v0, %v1476_v0 }
 0x135   :  { %v1478_v1 = vpop.f32.mrf.mxu0 }
 0x136   :  { %v516_v22 = vmul.f32 %v1478_v1, %v1478_v1 }
 0x137   :  { %v1480_v2 = vpop.f32.mrf.mxu0 }
 0x138   :  { %v517_v16 = vmul.f32 %v1480_v2, %v1480_v2  ;;  %v473_v20 = vadd.f32 %v1480_v2, %v1476_v0 }
 0x139   :  { %v1482_v3 = vpop.f32.mrf.mxu0 }
 0x13a   :  { %v518_v17 = vmul.f32 %v1482_v3, %v1482_v3  ;;  %v547_v25 = vadd.f32 %v517_v16, %v515_v19  ;;  %v494_v26 = vadd.f32 %v1482_v3, %v1478_v1 }
 0x13b   :  { %v1484_v4 = vpop.f32.mrf.mxu0 }
 0x13c   :  { %v519_v21 = vmul.f32 %v1484_v4, %v1484_v4  ;;  %v474_v27 = vadd.f32 %v473_v20, %v1484_v4  ;;  %v568_v29 = vadd.f32 %v518_v17, %v516_v22 }
 0x13d   :  { %v1486_v5 = vpop.f32.mrf.mxu0 }
 0x13e   :  { %v520_v23 = vmul.f32 %v1486_v5, %v1486_v5  ;;  %v548_v32 = vadd.f32 %v547_v25, %v519_v21  ;;  %v495_v33 = vadd.f32 %v494_v26, %v1486_v5 }
 0x13f   :  { %v1488_v6 = vpop.f32.mrf.mxu0 }
 0x140   :  { %v521_v28 = vmul.f32 %v1488_v6, %v1488_v6  ;;  %v475_v34 = vadd.f32 %v474_v27, %v1488_v6  ;;  %v569_v36 = vadd.f32 %v568_v29, %v520_v23 }
 0x141   :  { %v1490_v7 = vpop.f32.mrf.mxu0 }
 0x142   :  { %v522_v30 = vmul.f32 %v1490_v7, %v1490_v7  ;;  %v549_v39 = vadd.f32 %v548_v32, %v521_v28  ;;  %v496_v40 = vadd.f32 %v495_v33, %v1490_v7 }
 0x143   :  { %v1492_v8 = vpop.f32.mrf.mxu0 }
 0x144   :  { %v523_v35 = vmul.f32 %v1492_v8, %v1492_v8  ;;  %v476_v41 = vadd.f32 %v475_v34, %v1492_v8  ;;  %v570_v43 = vadd.f32 %v569_v36, %v522_v30 }
 0x145   :  { %v1494_v9 = vpop.f32.mrf.mxu0 }
 0x146   :  { %v524_v37 = vmul.f32 %v1494_v9, %v1494_v9  ;;  %v550_v46 = vadd.f32 %v549_v39, %v523_v35  ;;  %v497_v47 = vadd.f32 %v496_v40, %v1494_v9 }
 0x147   :  { %v1496_v10 = vpop.f32.mrf.mxu0 }
 0x148   :  { %v525_v42 = vmul.f32 %v1496_v10, %v1496_v10  ;;  %v477_v48 = vadd.f32 %v476_v41, %v1496_v10  ;;  %v571_v50 = vadd.f32 %v570_v43, %v524_v37 }
 0x149   :  { %v1498_v11 = vpop.f32.mrf.mxu0 }
 0x14a   :  { %v526_v44 = vmul.f32 %v1498_v11, %v1498_v11  ;;  %v551_v53 = vadd.f32 %v550_v46, %v525_v42  ;;  %v498_v54 = vadd.f32 %v497_v47, %v1498_v11 }
 0x14b   :  { %v1500_v12 = vpop.f32.mrf.mxu0 }
 0x14c   :  { %v527_v49 = vmul.f32 %v1500_v12, %v1500_v12  ;;  %v478_v55 = vadd.f32 %v477_v48, %v1500_v12  ;;  %v572_v57 = vadd.f32 %v571_v50, %v526_v44 }
 0x14d   :  { %v1502_v13 = vpop.f32.mrf.mxu0 }
 0x14e   :  { %v528_v51 = vmul.f32 %v1502_v13, %v1502_v13  ;;  %v552_v60 = vadd.f32 %v551_v53, %v527_v49  ;;  %v499_v61 = vadd.f32 %v498_v54, %v1502_v13 }
 0x14f   :  { %v1504_v14 = vpop.f32.mrf.mxu0 }
 0x150   :  { %v529_v56 = vmul.f32 %v1504_v14, %v1504_v14  ;;  %v479_v62 = vadd.f32 %v478_v55, %v1504_v14  ;;  %v573_v16 = vadd.f32 %v572_v57, %v528_v51 }
 0x151   :  { %v1506_v15 = vpop.f32.mrf.mxu0 }
 0x152   :  { %v530_v58 = vmul.f32 %v1506_v15, %v1506_v15  ;;  %v553_v20 = vadd.f32 %v552_v60, %v529_v56  ;;  %v500_v21 = vadd.f32 %v499_v61, %v1506_v15 }
 0x153   :  { %v1512_v18 = vpop.f32.mrf.mxu0 }
 0x154   :  { %v531_v63 = vmul.f32 %v1512_v18, %v1512_v18  ;;  %v480_v22 = vadd.f32 %v479_v62, %v1512_v18  ;;  %v574_v25 = vadd.f32 %v573_v16, %v530_v58 }
 0x155   :  { %v1524_v24 = vpop.f32.mrf.mxu0 }
 0x156   :  { %v532_v17 = vmul.f32 %v1524_v24, %v1524_v24  ;;  %v554_v28 = vadd.f32 %v553_v20, %v531_v63  ;;  %v501_v29 = vadd.f32 %v500_v21, %v1524_v24 }
 0x157   :  { %v1533_v31 = vpop.f32.mrf.mxu0 }
 0x158   :  { %v533_v23 = vmul.f32 %v1533_v31, %v1533_v31  ;;  %v481_v30 = vadd.f32 %v480_v22, %v1533_v31  ;;  %v575_v33 = vadd.f32 %v574_v25, %v532_v17 }
 0x159   :  { %v1541_v38 = vpop.f32.mrf.mxu0 }
 0x15a   :  { %v534_v26 = vmul.f32 %v1541_v38, %v1541_v38  ;;  %v555_v36 = vadd.f32 %v554_v28, %v533_v23  ;;  %v502_v37 = vadd.f32 %v501_v29, %v1541_v38 }
 0x15b   :  { %v1549_v45 = vpop.f32.mrf.mxu0 }
 0x15c   :  { %v535_v32 = vmul.f32 %v1549_v45, %v1549_v45  ;;  %v482_v39 = vadd.f32 %v481_v30, %v1549_v45  ;;  %v576_v41 = vadd.f32 %v575_v33, %v534_v26 }
 0x15d   :  { %v1557_v52 = vpop.f32.mrf.mxu0 }
 0x15e   :  { %v536_v34 = vmul.f32 %v1557_v52, %v1557_v52  ;;  %v556_v44 = vadd.f32 %v555_v36, %v535_v32  ;;  %v503_v46 = vadd.f32 %v502_v37, %v1557_v52 }
 0x15f   :  { %v1565_v59 = vpop.f32.mrf.mxu0 }
 0x160   :  { %v537_v40 = vmul.f32 %v1565_v59, %v1565_v59  ;;  %v483_v47 = vadd.f32 %v482_v39, %v1565_v59  ;;  %v577_v49 = vadd.f32 %v576_v41, %v536_v34 }
 0x161   :  { %v1573_v19 = vpop.f32.mrf.mxu0 }
 0x162   :  { %v538_v42 = vmul.f32 %v1573_v19, %v1573_v19  ;;  %v557_v53 = vadd.f32 %v556_v44, %v537_v40  ;;  %v504_v54 = vadd.f32 %v503_v46, %v1573_v19 }
 0x163   :  { %v1581_v27 = vpop.f32.mrf.mxu0 }
 0x164   :  { %v539_v48 = vmul.f32 %v1581_v27, %v1581_v27  ;;  %v484_v55 = vadd.f32 %v483_v47, %v1581_v27  ;;  %v578_v57 = vadd.f32 %v577_v49, %v538_v42 }
 0x165   :  { %v1589_v35 = vpop.f32.mrf.mxu0 }
 0x166   :  { %v540_v50 = vmul.f32 %v1589_v35, %v1589_v35  ;;  %v558_v61 = vadd.f32 %v557_v53, %v539_v48  ;;  %v505_v62 = vadd.f32 %v504_v54, %v1589_v35 }
 0x167   :  { %v1597_v43 = vpop.f32.mrf.mxu0 }
 0x168   :  { %v541_v56 = vmul.f32 %v1597_v43, %v1597_v43  ;;  %v485_v63 = vadd.f32 %v484_v55, %v1597_v43  ;;  %v579_v17 = vadd.f32 %v578_v57, %v540_v50 }
 0x169   :  { %v1605_v51 = vpop.f32.mrf.mxu0 }
 0x16a   :  { %v542_v58 = vmul.f32 %v1605_v51, %v1605_v51  ;;  %v559_v21 = vadd.f32 %v558_v61, %v541_v56  ;;  %v506_v22 = vadd.f32 %v505_v62, %v1605_v51 }
 0x16b   :  { %v1613_v60 = vpop.f32.mrf.mxu0 }
 0x16c   :  { %v543_v16 = vmul.f32 %v1613_v60, %v1613_v60  ;;  %v486_v23 = vadd.f32 %v485_v63, %v1613_v60  ;;  %v580_v26 = vadd.f32 %v579_v17, %v542_v58 }
 0x16d   :  { %v1619_v20 = vpop.f32.mrf.mxu0 }
 0x16e   :  { %v544_v25 = vmul.f32 %v1619_v20, %v1619_v20  ;;  %v560_v29 = vadd.f32 %v559_v21, %v543_v16  ;;  %v507_v30 = vadd.f32 %v506_v22, %v1619_v20 }
 0x16f   :  { %v1625_v28 = vpop.f32.mrf.mxu0 }
 0x170   :  { %v487_v32 = vadd.f32 %v486_v23, %v1625_v28  ;;  %v545_v33 = vmul.f32 %v1625_v28, %v1625_v28  ;;  %v581_v34 = vadd.f32 %v580_v26, %v544_v25 }
 0x171   :  { %v1631_v36 = vpop.f32.mrf.mxu0 }
 0x172   :  { %v488_v37 = vrot.slane %v487_v32, 4  ;;  %v561_v39 = vadd.f32 %v560_v29, %v545_v33  ;;  %v508_v40 = vadd.f32 %v507_v30, %v1631_v36  ;;  %v546_v41 = vmul.f32 %v1631_v36, %v1631_v36 }
 0x174   :  { %v489_v42 = vadd.f32 %v488_v37, %v487_v32  ;;  %v562_v44 = vrot.slane %v561_v39, 4  ;;  %v509_v46 = vrot.slane %v508_v40, 4  ;;  %v582_v47 = vadd.f32 %v581_v34, %v546_v41 }
 0x176   :  { %v490_v48 = vrot.slane %v489_v42, 2  ;;  %v563_v49 = vadd.f32 %v562_v44, %v561_v39  ;;  %v510_v50 = vadd.f32 %v509_v46, %v508_v40  ;;  %v583_v53 = vrot.slane %v582_v47, 4 }
 0x178   :  { %v491_v54 = vadd.f32 %v490_v48, %v489_v42  ;;  %v564_v55 = vrot.slane %v563_v49, 2  ;;  %v511_v56 = vrot.slane %v510_v50, 2  ;;  %v584_v57 = vadd.f32 %v583_v53, %v582_v47 }
 0x179   :  { %v603_v42 = vlaneseq }
 0x17a   :  { %v492_v58 = vrot.slane %v491_v54, 1  ;;  %v565_v61 = vadd.f32 %v564_v55, %v563_v49  ;;  %v512_v62 = vadd.f32 %v511_v56, %v510_v50  ;;  %v585_v63 = vrot.slane %v584_v57, 2  ;;  %v601_v49 = vld [vmem:[#allocation7] ss:$2 sm:$0x3] }
 0x17b   :  { %v604_v47 = vshrl.u32 %v603_v42, 7 }
 0x17c   :  { %v493_v16 = vadd.f32 %v492_v58, %v491_v54  ;;  %v566_v17 = vrot.slane %v565_v61, 1  ;;  %v513_v21 = vrot.slane %v512_v62, 1  ;;  %v586_v22 = vadd.f32 %v585_v63, %v584_v57 }
 0x17d   :  { %v605_v48 = vsub.s32 0, %v604_v47  ;;  %v609_v50 = vsub.s32 1, %v604_v47  ;;  %v1431_v54 = vmov 1966171168  }
 0x17e   :  { %v567_v23 = vadd.f32 %v566_v17, %v565_v61  ;;  %v589_v25 = vmul.f32 0.0078125, %v493_v16  ;;  %v514_v26 = vadd.f32 %v513_v21, %v512_v62  ;;  %v587_v29 = vrot.slane %v586_v22, 1 }
 0x17f   :  { %v606_v53 = vrot.slane %v601_v49, %v605_v48  ;;  %v623_v55 = vunpack.c.l.s4 %v1431_v54  ;;  %v610_v56 = vrot.slane %v601_v49, %v609_v50 }
 0x180   :  { %v591_v30 = vmul.f32 0.0078125, %v567_v23  ;;  %v593_v32 = vmul.f32 %v589_v25, %v589_v25  ;;  %v588_v33 = vadd.f32 %v587_v29, %v586_v22  ;;  %v590_v34 = vmul.f32 0.0078125, %v514_v26  ;;  %v616_v29 = vld [vmem:[#allocation7 + $0x1] ss:$2 sm:$0x3] }
 0x181   :  { %v624_v61 = vunpack.c.0.s8 %v623_v55 }
 0x182   :  { %v595_v37 = vsub.f32 %v591_v30, %v593_v32  ;;  %v592_v39 = vmul.f32 0.0078125, %v588_v33  ;;  %v594_v40 = vmul.f32 %v590_v34, %v590_v34 }
 0x183   :  { %v627_v21 = vsub.s32 %v624_v61, %v604_v47 }
 0x184   :  { %v597_v41 = vadd.f32 1e-05, %v595_v37  ;;  %v596_v44 = vsub.f32 %v592_v39, %v594_v40 }
 0x186   :  { %1311 = vrsqrt.f32 %v597_v41  ;;  %v598_v46 = vadd.f32 1e-05, %v596_v44 }
 0x188   :  { %1313 = vrsqrt.f32 %v598_v46 }
 0x193   :  { %v1312_v57 = vpop.eup %1311 }
 0x194   :  { %v613_v58 = vmul.f32 %v1312_v57, %v606_v53 }
 0x195   :  { %v1314_v62 = vpop.eup %1313 }
 0x196   :  { %v614_v63 = vmul.f32 %v1314_v62, %v610_v56  ;;  %v617_v16 = vmul.f32 %v613_v58, %v589_v25  ;;  %v1636_v26 = vrot.slane %v613_v58, %v605_v48 }
 0x198   :  { %v618_v17 = vmul.f32 %v614_v63, %v590_v34  ;;  %v1638_v32 = vrot.slane %v614_v63, %v605_v48  ;;  %v646_v37 = vmul.f32 %v1636_v26, %v1476_v0  ;;  %v648_v41 = vmul.f32 %v1636_v26, %v1480_v2 }
 0x199   :  { %v652_v55 = vmul.f32 %v1636_v26, %v1488_v6 }
 0x19a   :  { %v621_v22 = vcombine.low %v617_v16, %v618_v17  ;;  %v647_v25 = vmul.f32 %v1638_v32, %v1478_v1  ;;  %v649_v34 = vmul.f32 %v1638_v32, %v1482_v3  ;;  %v651_v42 = vmul.f32 %v1638_v32, %v1486_v5 }
 0x19b   :  { %v653_v44 = vmul.f32 %v1638_v32, %v1490_v7  ;;  %v650_v5 = vmul.f32 %v1636_v26, %v1484_v4  ;;  %v655_v57 = vmul.f32 %v1638_v32, %v1494_v9  ;;  %v657_v58 = vmul.f32 %v1638_v32, %v1498_v11 }
 0x19c   :  { %v628_v23 = vrot.slane %v621_v22, %v627_v21  ;;  %v677_v4 = vmul.f32 %v1638_v32, %v1631_v36  ;;  %v676_v9 = vmul.f32 %v1636_v26, %v1625_v28  ;;  %v654_v11 = vmul.f32 %v1636_v26, %v1492_v8 }
 0x19d   :  { %v659_v36 = vmul.f32 %v1638_v32, %v1502_v13  ;;  %v669_v8 = vmul.f32 %v1638_v32, %v1573_v19  ;;  %v670_v13 = vmul.f32 %v1636_v26, %v1581_v27  ;;  %v672_v19 = vmul.f32 %v1636_v26, %v1597_v43 }
 0x19e   :  { %v635_v30 = vrot.slane %v628_v23, %v627_v21  ;;  %v656_v21 = vmul.f32 %v1636_v26, %v1496_v10  ;;  %v661_v23 = vmul.f32 %v1638_v32, %v1506_v15  ;;  %v671_v10 = vmul.f32 %v1638_v32, %v1589_v35 }
 0x1a0   :  { %v637_v33 = vsub.f32 %v616_v29, %v635_v30  ;;  %v667_v29 = vmul.f32 %v1638_v32, %v1557_v52 }
 0x1a2   :  { %v1642_v39 = vrot.slane %v637_v33, %v605_v48  ;;  %v1644_v40 = vrot.slane %v637_v33, %v609_v50 }
 0x1a4   :  { %v690_v0 = vadd.f32 %v1644_v40, %v647_v25  ;;  %v692_v46 = vadd.f32 %v1644_v40, %v649_v34  ;;  %v689_v47 = vadd.f32 %v1642_v39, %v646_v37  ;;  %v691_v1 = vadd.f32 %v1642_v39, %v648_v41 }
 0x1a5   :  { %v694_v48 = vadd.f32 %v1644_v40, %v651_v42  ;;  %v696_v3 = vadd.f32 %v1644_v40, %v653_v44  ;;  %v693_v62 = vadd.f32 %v1642_v39, %v650_v5  ;;  %v695_v63 = vadd.f32 %v1642_v39, %v652_v55 }
 0x1a6   :  { %v722_v49 = vmax.f32 %v690_v0, 0.0  ;;  %v724_v2 = vmax.f32 %v692_v46, 0.0  ;;  %v721_v50 = vmax.f32 %v689_v47, 0.0  ;;  %v723_v53 = vmax.f32 %v691_v1, 0.0 }
 0x1a7   :  { %v726_v7 = vmax.f32 %v694_v48, 0.0  ;;  %v728_v54 = vmax.f32 %v696_v3, 0.0  ;;  %v698_v17 = vadd.f32 %v1644_v40, %v655_v57  ;;  %v700_v6 = vadd.f32 %v1644_v40, %v657_v58 }
 0x1a8   :  { %v754_v56 = vpack.c.bf16 %v724_v2, %v722_v49  ;;  %v753_v61 = vpack.c.bf16 %v723_v53, %v721_v50  ;;  %v720_v22 = vadd.f32 %v1644_v40, %v677_v4  ;;  %v725_v28 = vmax.f32 %v693_v62, 0.0 }
 0x1a9   :  { %v756_v16 = vpack.c.bf16 %v728_v54, %v726_v7  ;;  %v727_v30 = vmax.f32 %v695_v63, 0.0  ;;  %v730_v33 = vmax.f32 %v698_v17, 0.0  ;;  %v732_v37 = vmax.f32 %v700_v6, 0.0 }
 0x1aa   :  { %929 = vmatprep.mubr.bf16.mxu1 %v754_v56  ;;  %v673_v25 = vmul.f32 %v1638_v32, %v1605_v51  ;;  %v697_v15 = vadd.f32 %v1642_v39, %v654_v11  ;;  %v699_v52 = vadd.f32 %v1642_v39, %v656_v21  ;;  %v710_v34 = vadd.f32 %v1644_v40, %v667_v29 }
 0x1ab   :  { %930 = vmatmul.mubr.bf16.vlgmr.msra.gmra.mxu1 %v753_v61  ;;  %v752_v41 = vmax.f32 %v720_v22, 0.0  ;;  %v712_v35 = vadd.f32 %v1644_v40, %v669_v8  ;;  %v675_v42 = vmul.f32 %v1638_v32, %v1619_v20  ;;  %v674_v51 = vmul.f32 %v1636_v26, %v1613_v60 }
 0x1ac   :  { %937 = vmatprep.mubr.bf16.mxu1 %v756_v16  ;;  %v755_v44 = vpack.c.bf16 %v727_v30, %v725_v28  ;;  %v702_v27 = vadd.f32 %v1644_v40, %v659_v36  ;;  %v704_v0 = vadd.f32 %v1644_v40, %v661_v23  ;;  %v742_v46 = vmax.f32 %v710_v34, 0.0 }
 0x1ad   :  { %v758_v47 = vpack.c.bf16 %v732_v37, %v730_v33  ;;  %v744_v1 = vmax.f32 %v712_v35, 0.0  ;;  %v714_v48 = vadd.f32 %v1644_v40, %v671_v10  ;;  %v716_v43 = vadd.f32 %v1644_v40, %v673_v25 }
 0x1ae   :  { %v729_v3 = vmax.f32 %v697_v15, 0.0  ;;  %v731_v49 = vmax.f32 %v699_v52, 0.0  ;;  %v713_v20 = vadd.f32 %v1642_v39, %v670_v13  ;;  %v715_v2 = vadd.f32 %v1642_v39, %v672_v19 }
 0x1af   :  { %v764_v60 = vpack.c.bf16 %v744_v1, %v742_v46  ;;  %v746_v50 = vmax.f32 %v714_v48, 0.0  ;;  %v748_v5 = vmax.f32 %v716_v43, 0.0  ;;  %v718_v53 = vadd.f32 %v1644_v40, %v675_v42 }
 0x1b0   :  { %v734_v7 = vmax.f32 %v702_v27, 0.0  ;;  %v745_v54 = vmax.f32 %v713_v20, 0.0  ;;  %v747_v55 = vmax.f32 %v715_v2, 0.0  ;;  %v717_v56 = vadd.f32 %v1642_v39, %v674_v51 }
 0x1b1   :  { %v736_v57 = vmax.f32 %v704_v0, 0.0  ;;  %v766_v58 = vpack.c.bf16 %v748_v5, %v746_v50  ;;  %v750_v61 = vmax.f32 %v718_v53, 0.0  ;;  %v719_v62 = vadd.f32 %v1642_v39, %v676_v9 }
 0x1b2   :  { %v658_v63 = vmul.f32 %v1636_v26, %v1500_v12  ;;  %v660_v4 = vmul.f32 %v1636_v26, %v1504_v14  ;;  %v765_v16 = vpack.c.bf16 %v747_v55, %v745_v54  ;;  %v749_v17 = vmax.f32 %v717_v56, 0.0 }
 0x1b3   :  { %938 = vmatmul.mubr.bf16.gmra.mxu1 %v755_v44  ;;  %v663_v6 = vmul.f32 %v1638_v32, %v1524_v24  ;;  %v665_v11 = vmul.f32 %v1638_v32, %v1541_v38  ;;  %v768_v21 = vpack.c.bf16 %v752_v41, %v750_v61  ;;  %v751_v22 = vmax.f32 %v719_v62, 0.0 }
 0x1b4   :  { %945 = vmatprep.mubr.bf16.mxu1 %v758_v47  ;;  %v757_v36 = vpack.c.bf16 %v731_v49, %v729_v3  ;;  %v701_v23 = vadd.f32 %v1642_v39, %v658_v63  ;;  %v703_v9 = vadd.f32 %v1642_v39, %v660_v4  ;;  %v760_v29 = vpack.c.bf16 %v736_v57, %v734_v7 }
 0x1b5   :  { %v706_v12 = vadd.f32 %v1644_v40, %v663_v6  ;;  %v708_v14 = vadd.f32 %v1644_v40, %v665_v11  ;;  %v767_v28 = vpack.c.bf16 %v751_v22, %v749_v17  ;;  %v662_v38 = vmul.f32 %v1636_v26, %v1512_v18 }
 0x1b6   :  { %v733_v30 = vmax.f32 %v701_v23, 0.0  ;;  %v735_v24 = vmax.f32 %v703_v9, 0.0  ;;  %v664_v32 = vmul.f32 %v1636_v26, %v1533_v31  ;;  %v666_v52 = vmul.f32 %v1636_v26, %v1549_v45 }
 0x1b7   :  { %v738_v8 = vmax.f32 %v706_v12, 0.0  ;;  %v740_v10 = vmax.f32 %v708_v14, 0.0  ;;  %v705_v37 = vadd.f32 %v1642_v39, %v662_v38  ;;  %v668_v34 = vmul.f32 %v1636_v26, %v1565_v59 }
 0x1b8   :  { %v759_v33 = vpack.c.bf16 %v735_v24, %v733_v30  ;;  %v707_v25 = vadd.f32 %v1642_v39, %v664_v32  ;;  %v709_v19 = vadd.f32 %v1642_v39, %v666_v52 }
 0x1b9   :  { %v762_v13 = vpack.c.bf16 %v740_v10, %v738_v8  ;;  %v737_v40 = vmax.f32 %v705_v37, 0.0  ;;  %v711_v31 = vadd.f32 %v1642_v39, %v668_v34 }
 0x1ba   :  { %v739_v15 = vmax.f32 %v707_v25, 0.0  ;;  %v741_v41 = vmax.f32 %v709_v19, 0.0 }
 0x1bb   :  { %946 = vmatmul.mubr.bf16.gmra.mxu1 %v757_v36  ;;  %v743_v35 = vmax.f32 %v711_v31, 0.0 }
 0x1bc   :  { %953 = vmatprep.mubr.bf16.mxu1 %v760_v29  ;;  %v761_v18 = vpack.c.bf16 %v739_v15, %v737_v40 }
 0x1bd   :  { %v763_v42 = vpack.c.bf16 %v743_v35, %v741_v41 }
 0x1c3   :  { %954 = vmatmul.mubr.bf16.gmra.mxu1 %v759_v33 }
 0x1c4   :  { %961 = vmatprep.mubr.bf16.mxu1 %v762_v13 }
 0x1cb   :  { %962 = vmatmul.mubr.bf16.gmra.mxu1 %v761_v18 }
 0x1cc   :  { %969 = vmatprep.mubr.bf16.mxu1 %v764_v60 }
 0x1d3   :  { %970 = vmatmul.mubr.bf16.gmra.mxu1 %v763_v42 }
 0x1d4   :  { %977 = vmatprep.mubr.bf16.mxu1 %v766_v58 }
 0x1db   :  { %978 = vmatmul.mubr.bf16.gmra.mxu1 %v765_v16 }
 0x1dc   :  { %985 = vmatprep.mubr.bf16.mxu1 %v768_v21 }
 0x1e3   :  { %986 = vmatmul.mubr.bf16.gmra.mxu1 %v767_v28 }
 0x26b   :  { %v1165_v51 = vpop.f32.mrf.mxu1 }
 0x26d   :  { %v1166_v45 = vpop.f32.mrf.mxu1 }
 0x26e   :  { %v1167_v44 = vadd.f32 %v1166_v45, %v1165_v51 }
 0x26f   :  { %v1168_v27 = vpop.f32.mrf.mxu1 }
 0x270   :  { %998 = vst [vmem:[#allocation10] sm:$0xff] %v1167_v44 }
 0x271   :  { %v1169_v59 = vpop.f32.mrf.mxu1 }
 0x272   :  { %v1170_v26 = vadd.f32 %v1169_v59, %v1168_v27 }
 0x273   :  { %v1171_v0 = vpop.f32.mrf.mxu1 }
 0x274   :  { %999 = vst [vmem:[#allocation10 + $0x8] sm:$0xff] %v1170_v26 }
 0x275   :  { %v1172_v39 = vpop.f32.mrf.mxu1 }
 0x276   :  { %v1173_v46 = vadd.f32 %v1172_v39, %v1171_v0 }
 0x277   :  { %v1174_v47 = vpop.f32.mrf.mxu1 }
 0x278   :  { %1000 = vst [vmem:[#allocation10 + $0x10] sm:$0xff] %v1173_v46 }
 0x279   :  { %v1175_v1 = vpop.f32.mrf.mxu1 }
 0x27a   :  { %v1176_v48 = vadd.f32 %v1175_v1, %v1174_v47 }
 0x27b   :  { %v1177_v43 = vpop.f32.mrf.mxu1 }
 0x27c   :  { %1001 = vst [vmem:[#allocation10 + $0x18] sm:$0xff] %v1176_v48 }
 0x27d   :  { %v1178_v3 = vpop.f32.mrf.mxu1 }
 0x27e   :  { %v1179_v49 = vadd.f32 %v1178_v3, %v1177_v43 }
 0x27f   :  { %v1180_v20 = vpop.f32.mrf.mxu1 }
 0x280   :  { %1002 = vst [vmem:[#allocation10 + $0x20] sm:$0xff] %v1179_v49 }
 0x281   :  { %v1181_v2 = vpop.f32.mrf.mxu1 }
 0x282   :  { %v1182_v60 = vadd.f32 %v1181_v2, %v1180_v20 }
 0x283   :  { %v1183_v50 = vpop.f32.mrf.mxu1 }
 0x284   :  { %1003 = vst [vmem:[#allocation10 + $0x28] sm:$0xff] %v1182_v60 }
 0x285   :  { %v1184_v5 = vpop.f32.mrf.mxu1 }
 0x286   :  { %v1185_v53 = vadd.f32 %v1184_v5, %v1183_v50 }
 0x287   :  { %v1186_v7 = vpop.f32.mrf.mxu1 }
 0x288   :  { %1004 = vst [vmem:[#allocation10 + $0x30] sm:$0xff] %v1185_v53 }
 0x289   :  { %v1187_v54 = vpop.f32.mrf.mxu1 }
 0x28a   :  { %v1188_v55 = vadd.f32 %v1187_v54, %v1186_v7 }
 0x28b   :  { %v1189_v56 = vpop.f32.mrf.mxu1 }
 0x28c   :  { %1005 = vst [vmem:[#allocation10 + $0x38] sm:$0xff] %v1188_v55 }
 0x28d   :  { %v1190_v57 = vpop.f32.mrf.mxu1 }
 0x28e   :  { %v1191_v58 = vadd.f32 %v1190_v57, %v1189_v56 }
 0x28f   :  { %v1192_v61 = vpop.f32.mrf.mxu1 }
 0x290   :  { %1006 = vst [vmem:[#allocation10 + $0x40] sm:$0xff] %v1191_v58 }
 0x291   :  { %v1193_v62 = vpop.f32.mrf.mxu1 }
 0x292   :  { %v1194_v63 = vadd.f32 %v1193_v62, %v1192_v61 }
 0x293   :  { %v1195_v4 = vpop.f32.mrf.mxu1 }
 0x294   :  { %1007 = vst [vmem:[#allocation10 + $0x48] sm:$0xff] %v1194_v63 }
 0x295   :  { %v1196_v16 = vpop.f32.mrf.mxu1 }
 0x296   :  { %v1197_v17 = vadd.f32 %v1196_v16, %v1195_v4 }
 0x297   :  { %v1198_v6 = vpop.f32.mrf.mxu1 }
 0x298   :  { %1008 = vst [vmem:[#allocation10 + $0x50] sm:$0xff] %v1197_v17 }
 0x299   :  { %v1199_v11 = vpop.f32.mrf.mxu1 }
 0x29a   :  { %v1200_v21 = vadd.f32 %v1199_v11, %v1198_v6 }
 0x29b   :  { %v1201_v22 = vpop.f32.mrf.mxu1 }
 0x29c   :  { %1009 = vst [vmem:[#allocation10 + $0x58] sm:$0xff] %v1200_v21 }
 0x29d   :  { %v1202_v36 = vpop.f32.mrf.mxu1 }
 0x29e   :  { %v1203_v23 = vadd.f32 %v1202_v36, %v1201_v22 }
 0x29f   :  { %v1204_v9 = vpop.f32.mrf.mxu1 }
 0x2a0   :  { %1010 = vst [vmem:[#allocation10 + $0x60] sm:$0xff] %v1203_v23 }
 0x2a1   :  { %v1205_v29 = vpop.f32.mrf.mxu1 }
 0x2a2   :  { %v1206_v12 = vadd.f32 %v1205_v29, %v1204_v9 }
 0x2a3   :  { %v1207_v14 = vpop.f32.mrf.mxu1 }
 0x2a4   :  { %1011 = vst [vmem:[#allocation10 + $0x68] sm:$0xff] %v1206_v12 }
 0x2a5   :  { %v1208_v28 = vpop.f32.mrf.mxu1 }
 0x2a6   :  { %v1209_v30 = vadd.f32 %v1208_v28, %v1207_v14 }
 0x2a7   :  { %v1210_v24 = vpop.f32.mrf.mxu1 }
 0x2a8   :  { %1012 = vst [vmem:[#allocation10 + $0x70] sm:$0xff] %v1209_v30 }
 0x2a9   :  { %v1211_v8 = vpop.f32.mrf.mxu1 }
 0x2aa   :  { %v1212_v10 = vadd.f32 %v1211_v8, %v1210_v24 }
 0x2ac   :  { %1013 = vst [vmem:[#allocation10 + $0x78] sm:$0xff] %v1212_v10 }
 0x2ad   :  { %1406 = shalt.err (!%p1403_p10)
}
 0x2ae   :  { %1077 = dma.vmem_to_hbm [thread:$0]  %s1072_s3, 2048, %s1750_s4, [#allocation4], %s1425_s20, %s1425_s20, %s1426_s21  }
 0x2af   :  { %1421 = dma.done.wait [#allocation4], 2048  }
 0x2b0   :  { %1422 = vsyncadd [#allocation4], 4294965248 }
 0x2b1   :  { %1081 = vsyncpa [#allocation3], 1 }
 0x2b2   :  { %1082 = vsyncpa [#allocation6], 1 }
 0x2b3   :  { %1083 = vsyncpa [#allocation9], 1 }
 0x2b4   :  { %1084 = vsyncpa [#allocation4], 1 }

</bundles_post_ra>
